<compile_context>
chip_gen: v5e
topology: v5e:2x2
jax: 0.10.0
libtpu: 0.0.40
codegen_flags: <defaults>
</compile_context>

<pallas_src>
import jax
import jax.numpy as jnp
from jax.experimental import pallas as pl
from jax.experimental.pallas import tpu as pltpu


def _round_up(x, m):
    return ((x + m - 1) // m) * m


def _cdiv(a, b):
    return -(-a // b)


def _sublane_min(dtype):
    # Packed sublane tiling minimum for the second-to-last block dim.
    return {4: 8, 2: 16, 1: 32}.get(jnp.dtype(dtype).itemsize, 8)


def _decoder_kernel(z_ref, wt_ref, b_ref, o_ref):
    # z_ref: (tm, c_in), wt_ref: (c_in, tn) [pre-transposed], b_ref: (1, tn),
    # o_ref: (tm, tn).  f32 MXU accumulation, bias added in f32.
    acc = jnp.dot(z_ref[...], wt_ref[...], preferred_element_type=jnp.float32)
    o_ref[...] = (acc + b_ref[...].astype(jnp.float32)).astype(o_ref.dtype)


def prepare_decoder_params(weight, bias):
    """One-time parameter prep, hoisted out of the forward hot path.

    weight: (c_out, c_in) nn.Linear layout -> returns W.T of shape (c_in, c_out)
    bias:   (c_out,)                       -> returns (1, c_out)
    """
    return weight.T, bias.reshape(1, -1)


# Conservative budgets that fit v7x's 64 MiB VMEM/TC as well as v5e/v6e's 128 MiB.
_WEIGHT_VMEM_BUDGET = 12 * 1024 * 1024     # resident weight incl. buffering factor
_TILE_VMEM_BUDGET = 16 * 1024 * 1024       # streamed z/out tiles + f32 matmul temp
_VMEM_LIMIT_CAP = 40 * 1024 * 1024         # scoped-VMEM ceiling (headroom on v7x)
_SINGLE_BUFFER_WEIGHT_BYTES = 4 * 1024 * 1024  # Buffered(1) weights above this size


def decoder_forward(z, wt, bias2d, *, max_tile_rows=1024, small_fallback_elems=0):
    """Linear forward: z @ W.T + b, with prepared params.

    z:      (N, c_in)
    wt:     (c_in, c_out)  -- already transposed (prepare_decoder_params)
    bias2d: (1, c_out)
    """
    N, c_in = z.shape
    c_in_w, c_out = wt.shape
    assert c_in_w == c_in, "weight was not prepared with prepare_decoder_params"

    # Tiny problems: pallas_call launch overhead dwarfs the math -> plain XLA.
    if N * c_in * c_out < small_fallback_elems:
        out = jnp.dot(z, wt, preferred_element_type=jnp.float32)
        return (out + bias2d.astype(jnp.float32)).astype(z.dtype)

    isz_z = jnp.dtype(z.dtype).itemsize
    isz_w = jnp.dtype(wt.dtype).itemsize
    isz_b = jnp.dtype(bias2d.dtype).itemsize
    isz_o = isz_z
    sub = _sublane_min(z.dtype)

    # ---- output-channel tiling: the resident weight tile must fit its budget.
    w_single = c_in * c_out * isz_w
    single_buffer_weight = w_single > _SINGLE_BUFFER_WEIGHT_BYTES
    w_bufs = 1 if single_buffer_weight else 2
    if w_bufs * w_single <= _WEIGHT_VMEM_BUDGET:
        tn = c_out                      # whole pre-transposed weight VMEM-resident
    else:
        # Fallback: tile c_out in lane-aligned (multiple-of-128) chunks.
        tn = max(128, (_WEIGHT_VMEM_BUDGET // (w_bufs * c_in * isz_w)) // 128 * 128)
        tn = min(tn, _round_up(c_out, 128))
    num_out_tiles = _cdiv(c_out, tn)
    # TODO(synk): add a K-tiled (c_in) accumulation path for decoders whose c_in
    # is so large that even a (tm, c_in) activation tile does not fit VMEM.

    # ---- row tiling: honest per-step VMEM accounting
    # (2x z tile, 2x out tile, f32 matmul temp; weight/bias counted separately).
    bytes_per_row = 2 * c_in * isz_z + 2 * tn * isz_o + tn * 4
    tm = _TILE_VMEM_BUDGET // max(bytes_per_row, 1)
    tm = max(sub, min(max_tile_rows, tm)) // sub * sub
    # Keep >= 4 row tiles when N is large enough (pipelining + v7x 2-TC sharding).
    if N > 4 * sub:
        tm = min(tm, max(sub, _round_up(_cdiv(N, 4), sub)))
    if tm >= N:
        tm = N                          # single full-extent row block (always legal)
        num_row_tiles = 1
    else:
        num_row_tiles = _cdiv(N, tm)
        # Balance tiles so the ragged last tile stays small (edge rows are masked).
        tm = min(_round_up(_cdiv(N, num_row_tiles), sub), tm)
        num_row_tiles = _cdiv(N, tm)

    # ---- explicit scoped VMEM derived from the actual footprint.
    vmem_total = (w_bufs * c_in * tn * isz_w
                  + w_bufs * tn * isz_b
                  + 2 * tm * c_in * isz_z
                  + 2 * tm * tn * isz_o
                  + tm * tn * 4)
    vmem_limit = int(min(max(vmem_total * 5 // 4 + (2 << 20), 16 << 20),
                         _VMEM_LIMIT_CAP))

    # Constant-index weight/bias blocks: single-buffer them when large.
    w_spec_kwargs = {}
    b_spec_kwargs = {}
    if single_buffer_weight:
        w_spec_kwargs["pipeline_mode"] = pl.Buffered(1)
        b_spec_kwargs["pipeline_mode"] = pl.Buffered(1)

    # Grid: out-tile axis OUTERMOST so the resident weight/bias block stays put
    # across the inner row loop (no per-row-tile weight re-fetch).
    grid = (num_out_tiles, num_row_tiles)

    # TODO(synk): for v6e/v7x a bf16 z/weight path (keeping f32 accumulation)
    # would halve HBM traffic; left to the caller since it changes numerics.
    out = pl.pallas_call(
        _decoder_kernel,
        out_shape=jax.ShapeDtypeStruct((N, c_out), z.dtype),
        grid_spec=pltpu.PrefetchScalarGridSpec(
            num_scalar_prefetch=0,
            grid=grid,
            in_specs=[
                pl.BlockSpec((tm, c_in), lambda j, i: (i, 0)),               # rows streamed
                pl.BlockSpec((c_in, tn), lambda j, i: (0, j), **w_spec_kwargs),  # weight resident
                pl.BlockSpec((1, tn), lambda j, i: (0, j), **b_spec_kwargs),     # bias resident
            ],
            out_specs=pl.BlockSpec((tm, tn), lambda j, i: (i, j)),
        ),
        compiler_params=pltpu.CompilerParams(
            dimension_semantics=("parallel", "parallel"),
            vmem_limit_bytes=vmem_limit,
        ),
    )(z, wt, bias2d)
    return out


if __name__ == "__main__":
    in_channels, out_channels = 32, 16
    N = 8  # number of nodes / rows

    key = jax.random.PRNGKey(0)
    kz, kw, kb = jax.random.split(key, 3)

    z = jax.random.normal(kz, (N, in_channels), dtype=jnp.float32)
    # Deterministic init mimicking nn.Linear's uniform(-1/sqrt(fan_in), 1/sqrt(fan_in))
    bound = 1.0 / (in_channels ** 0.5)
    weight = jax.random.uniform(
        kw, (out_channels, in_channels), minval=-bound, maxval=bound, dtype=jnp.float32
    )
    bias = jax.random.uniform(
        kb, (out_channels,), minval=-bound, maxval=bound, dtype=jnp.float32
    )

    # One-time weight prep (hoisted out of the per-call hot path).
    wt, b2d = prepare_decoder_params(weight, bias)
    wt = jax.block_until_ready(wt)

    # small_fallback_elems=0 -> always take the Pallas path, even at this tiny shape.
    out = decoder_forward(z, wt, b2d, small_fallback_elems=0)
    out = jax.block_until_ready(out)

    # Reference check in plain JAX
    ref = z @ weight.T + bias
    assert out.shape == (N, out_channels)
    assert jnp.allclose(out, ref, atol=1e-5, rtol=1e-5)

    print("KERNEL_OK")
</pallas_src>

<mosaic_0001>
module attributes {stable_mosaic.version = 11 : i64} {
  func.func @_decoder_kernel(%arg0: i32, %arg1: i32, %arg2: memref<8x32xf32, #tpu.memory_space<vmem>>, %arg3: memref<32x16xf32, #tpu.memory_space<vmem>>, %arg4: memref<1x16xf32, #tpu.memory_space<vmem>>, %arg5: memref<8x16xf32, #tpu.memory_space<vmem>>) attributes {dimension_semantics = [#tpu.dimension_semantics<parallel>, #tpu.dimension_semantics<parallel>], iteration_bounds = array<i64: 1, 1>, scalar_prefetch = 0 : i64, scratch_operands = 0 : i64, tpu.core_type = #tpu.core_type<tc>, window_params = [{transform_indices = @transform_0, window_bounds = array<i64: 8, 32>}, {transform_indices = @transform_1, window_bounds = array<i64: 32, 16>}, {transform_indices = @transform_2, window_bounds = array<i64: 1, 16>}, {transform_indices = @transform_3, window_bounds = array<i64: 8, 16>}]} {
    %c0 = arith.constant 0 : index
    %c0_0 = arith.constant 0 : index
    %0 = vector.load %arg2[%c0, %c0_0] : memref<8x32xf32, #tpu.memory_space<vmem>>, vector<8x32xf32>
    %c0_1 = arith.constant 0 : index
    %c0_2 = arith.constant 0 : index
    %1 = vector.load %arg3[%c0_1, %c0_2] : memref<32x16xf32, #tpu.memory_space<vmem>>, vector<32x16xf32>
    %cst = arith.constant dense<0.000000e+00> : vector<8x16xf32>
    %2 = tpu.matmul %0, %1, %cst {dimension_numbers = #tpu.dot_dimension_numbers<[1], [0], [0], [1], [0, 0, 1, 1], [], []>} : vector<8x32xf32>, vector<32x16xf32>, vector<8x16xf32> -> vector<8x16xf32>
    %c0_3 = arith.constant 0 : index
    %c0_4 = arith.constant 0 : index
    %3 = vector.load %arg4[%c0_3, %c0_4] : memref<1x16xf32, #tpu.memory_space<vmem>>, vector<1x16xf32>
    %4 = vector.broadcast %3 : vector<1x16xf32> to vector<8x16xf32>
    %5 = arith.addf %2, %4 : vector<8x16xf32>
    %c0_5 = arith.constant 0 : index
    %c0_6 = arith.constant 0 : index
    %6 = vector.load %arg5[%c0_5, %c0_6] : memref<8x16xf32, #tpu.memory_space<vmem>>, vector<8x16xf32>
    tpu.vector_store %arg5[%c0_5, %c0_6], %5 {strides = array<i32>} : memref<8x16xf32, #tpu.memory_space<vmem>>, vector<8x16xf32>,
    return
  }
  func.func @transform_0(%arg0: i32, %arg1: i32) -> (i32, i32) {
    %c0_i32 = arith.constant 0 : i32
    %c0_i32_0 = arith.constant 0 : i32
    return %arg1, %c0_i32 : i32, i32
  }
  func.func @transform_1(%arg0: i32, %arg1: i32) -> (i32, i32) {
    %c0_i32 = arith.constant 0 : i32
    %c0_i32_0 = arith.constant 0 : i32
    return %c0_i32, %arg0 : i32, i32
  }
  func.func @transform_2(%arg0: i32, %arg1: i32) -> (i32, i32) {
    %c0_i32 = arith.constant 0 : i32
    %c0_i32_0 = arith.constant 0 : i32
    return %c0_i32, %arg0 : i32, i32
  }
  func.func @transform_3(%arg0: i32, %arg1: i32) -> (i32, i32) {
    %c0_i32 = arith.constant 0 : i32
    return %arg1, %arg0 : i32, i32
  }
}

</mosaic_0001>

<bundles_post_ra>
// kernel: tpu_custom_call.1
= control target key start
LH: loop header
LB: loop body
LE: loop exit
PB: predicated region body
PF: predicated region fallthrough
CT: control target
= control target key end

     0   :  { %s137_s0 = inlined_call_operand.vmem [shape: f32[8,32], index: 0, kind: input, shape index: {}]   ;;  %s138_s1 = inlined_call_operand.vmem [shape: f32[32,16], index: 1, kind: input, shape index: {}]   ;;  %s139_s2 = inlined_call_operand.vmem [shape: f32[1,16], index: 2, kind: input, shape index: {}]   ;;  %s140_s3 = inlined_call_operand.hbm [shape: f32[8,16], index: 3, kind: output, shape index: {}]  }
   0x1   :  { %v19_v0 = vld [vmem:[%s138_s1 + $0x18] sm:$0xff]  ;;  %v18_v1 = vld [vmem:[%s138_s1 + $0x10] sm:$0xff]  ;;  %v17_v2 = vld [vmem:[%s138_s1 + $0x8] sm:$0xff] }
   0x2   :  { %40 = vmatpush.msra.mxu0 %v19_v0 }
   0x3   :  { %8 = vsyncpa [#allocation3], 0  ;;  %v16_v3 = vld [vmem:[%s138_s1] sm:$0xff]  ;;  %vm24_vm0 = vcmask 261120   ;;  %s95_s24 = smov [#allocation2]   ;;  %s57_s28 = sshll.u32 %s140_s3, 4  ;;  %s58_s28 = int_to_ptr.hbm [resolvable:$true] %s57_s28 }
   0x4   :  { %41 = vmatpush.msra.mxu0 %v18_v1  ;;  %v15_v4 = vld [vmem:[%s137_s0] sm:$0xff]  ;;  %s55_s25 = sshll.u32 %s95_s24, 4  ;;  %vm48_vm1 = vcmask 130048   ;;  %s56_s25 = int_to_ptr.vmem [resolvable:$true] %s55_s25 }
   0x5   :  { %v68_v5 = vld [vmem:[%s139_s2] ss:$0 sm:$0xff] }
   0x6   :  { %42 = vmatpush.msra.mxu0 %v17_v2 }
   0x8   :  { %43 = vmatpush.msra.mxu0 %v16_v3 }
   0x9   :  { %66 = vmatmul.msk.f32.vlgmr.msra.gmra.mxu0 %vm24_vm0, %v15_v4 }
  0x86   :  { %v45_v6 = vpop.f32.mrf.mxu0 }
  0x87   :  { %v46_v7 = vadd.f32 %v68_v5, %v45_v6 }
  0x89   :  { %49 = vst.msk [vmem:[#allocation2] sm:$0xff] %vm48_vm1, %v46_v7 }
  0x8a   :  { %60 = dma.vmem_to_hbm [thread:$0]  %s56_s25, 128, %s58_s28, [#allocation3]  }
  0x8b   :  { %93 = dma.done.wait [#allocation3], 128  }
  0x8c   :  { %94 = vsyncadd [#allocation3], 4294967168 }
  0x8d   :  { %65 = vsyncpa [#allocation3], 1 }

</bundles_post_ra>
